<compile_context>
chip_gen: v5e
topology: v5e:2x2
jax: 0.10.0
libtpu: 0.0.40
codegen_flags: <defaults>
</compile_context>

<pallas_src>
import math

import jax
import jax.numpy as jnp
from jax import lax
from jax.experimental import pallas as pl
from jax.experimental.pallas import tpu as pltpu


def _round_up(x, m):
    return ((x + m - 1) // m) * m


def _nbytes(shape, dtype):
    return math.prod(shape) * jnp.dtype(dtype).itemsize


def _vmem_limit(block_bytes, scratch_bytes=0):
    """Scoped-VMEM limit: double-buffered blocks + scratch + margin, clamped."""
    need = 2 * block_bytes + scratch_bytes + (4 << 20)
    # >= 32 MiB (default scoped limit); <= 96 MiB (v5e/v6e have 128 MiB physical,
    # v7x only 64 MiB/TC -- very large tables should go bf16 or HBM-resident).
    return int(min(max(need, 32 << 20), 96 << 20))


# ---------------------------------------------------------------------------
# Kernel A (small vocab): mean embedding as one MXU matmul, counts @ table.
# ---------------------------------------------------------------------------
def _make_counts_kernel(inv_len):
    def kernel(cnt_ref, emb_ref, w1_ref, b1_ref, w2_ref, b2_ref, out_ref):
        # (TB, Vp) @ (Vp, Dp) on the MXU with f32 accumulation, then * 1/L.
        mean_emb = jnp.dot(cnt_ref[...], emb_ref[...],
                           preferred_element_type=jnp.float32) * inv_len
        h = jnp.dot(mean_emb.astype(w1_ref.dtype), w1_ref[...],
                    preferred_element_type=jnp.float32) + b1_ref[...]
        h = jnp.maximum(h, 0.0)
        out_ref[...] = (jnp.dot(h.astype(w2_ref.dtype), w2_ref[...],
                                preferred_element_type=jnp.float32) + b2_ref[...])
    return kernel


# ---------------------------------------------------------------------------
# Kernel B (large vocab): sublane-packed row gather from the VMEM table.
# ---------------------------------------------------------------------------
def _make_gather_kernel(seq_len):
    inv_len = 1.0 / seq_len
    n_pairs = seq_len // 2
    has_tail = (seq_len % 2) == 1

    def kernel(ids_ref, emb_ref, w1_ref, b1_ref, w2_ref, b2_ref, out_ref, acc_ref):
        tb, dp = acc_ref.shape               # (batch tile, padded emb dim)
        b0 = pl.program_id(0) * tb           # global row offset of this tile
        # Hoisted zero constant (JAX does not CSE broadcast_in_dim).
        zero_row = jnp.zeros((1, dp), jnp.float32)

        # 8 batch rows per step -> one full-vreg (8, Dp) store (no masked vst).
        @pl.loop(0, tb // 8)
        def _(g):
            r0 = pl.multiple_of(g * 8, 8)
            rows = []
            for rr in range(8):              # static: builds the (8, Dp) tile
                base = (b0 + r0 + rr) * seq_len
                # Two interleaved accumulators break the serial add chain so
                # the unrolled row loads can overlap.
                def tok_pair(t, carry):
                    s0, s1 = carry
                    t2 = 2 * t
                    e0 = emb_ref[pl.ds(ids_ref[base + t2], 1), :]
                    e1 = emb_ref[pl.ds(ids_ref[base + t2 + 1], 1), :]
                    return (s0 + e0.astype(jnp.float32),
                            s1 + e1.astype(jnp.float32))

                s0, s1 = lax.fori_loop(0, n_pairs, tok_pair,
                                       (zero_row, zero_row), unroll=True)
                row = s0 + s1
                if has_tail:
                    tail = emb_ref[pl.ds(ids_ref[base + seq_len - 1], 1), :]
                    row = row + tail.astype(jnp.float32)
                rows.append(row)
            acc_ref[pl.ds(r0, 8), :] = jnp.concatenate(rows, axis=0)

        mean_emb = acc_ref[...] * inv_len
        h = jnp.dot(mean_emb.astype(w1_ref.dtype), w1_ref[...],
                    preferred_element_type=jnp.float32) + b1_ref[...]
        h = jnp.maximum(h, 0.0)
        out_ref[...] = (jnp.dot(h.astype(w2_ref.dtype), w2_ref[...],
                                preferred_element_type=jnp.float32) + b2_ref[...])
    return kernel


# ---------------------------------------------------------------------------
# Parameter prep (call ONCE, outside the per-forward hot path).
# ---------------------------------------------------------------------------
def prepare_params(emb, w1, b1, w2, b2, *, param_dtype=jnp.float32,
                   small_vocab_threshold=2048):
    """Pad params to MXU/lane-friendly shapes. emb/w1/w2 stored in `param_dtype`
    (f32 default; bf16 halves VMEM and uses the bf16 MXU on v6e/v7x); biases
    stay f32.  Returns (arrays_dict, use_counts_flag)."""
    V, D = emb.shape
    H = w1.shape[1]
    C = w2.shape[1]
    use_counts = V <= small_vocab_threshold

    Dp = _round_up(D, 128)
    Hp = _round_up(H, 128)
    Cp = _round_up(C, 128)
    # counts path: Vp is an MXU contraction dim -> pad to 128; gather path:
    # keep the table sublane-aligned only.
    Vp = _round_up(V, 128) if use_counts else _round_up(V, 8)

    pd, f32 = param_dtype, jnp.float32
    arrays = {
        "emb": jnp.zeros((Vp, Dp), pd).at[:V, :D].set(emb.astype(pd)),
        "w1": jnp.zeros((Dp, Hp), pd).at[:D, :H].set(w1.astype(pd)),
        "b1": jnp.zeros((1, Hp), f32).at[:, :H].set(b1.reshape(1, H).astype(f32)),
        "w2": jnp.zeros((Hp, Cp), pd).at[:H, :C].set(w2.astype(pd)),
        "b2": jnp.zeros((1, Cp), f32).at[:, :C].set(b2.reshape(1, C).astype(f32)),
    }
    return arrays, use_counts


# ---------------------------------------------------------------------------
# Forward wrapper.
# ---------------------------------------------------------------------------
def ffnn_forward(batch_inputs, arrays, *, n_classes, use_counts, batch_tile=256):
    """batch_inputs: (B, L) int token ids.  Returns (B, n_classes) f32 logits."""
    B, L = batch_inputs.shape
    emb_p, w1_p, b1_p, w2_p, b2_p = (arrays["emb"], arrays["w1"], arrays["b1"],
                                     arrays["w2"], arrays["b2"])
    Vp, Dp = emb_p.shape
    Hp = w1_p.shape[1]
    Cp = w2_p.shape[1]
    f32 = jnp.float32

    # Batch tiling: sublane-aligned, and >=2 tiles when possible so the
    # "parallel" grid axis can be split across v7x's two TensorCores.
    Bp = _round_up(B, 8)
    TB = min(batch_tile, max(8, _round_up((Bp + 1) // 2, 8)))
    Bp = _round_up(Bp, TB)
    grid = (Bp // TB,)

    ids = batch_inputs.astype(jnp.int32)

    common_bytes = (_nbytes((Vp, Dp), emb_p.dtype) + _nbytes((Dp, Hp), w1_p.dtype)
                    + _nbytes((1, Hp), f32) + _nbytes((Hp, Cp), w2_p.dtype)
                    + _nbytes((1, Cp), f32) + _nbytes((TB, Cp), f32))

    if use_counts:
        # ---- Path A: token counts built in the wrapper -> counts @ table ----
        vocab_iota = jnp.arange(Vp, dtype=jnp.int32)
        counts = (ids[:, :, None] == vocab_iota[None, None, :]).sum(
            axis=1, dtype=jnp.int32)
        counts_p = jnp.zeros((Bp, Vp), emb_p.dtype).at[:B].set(
            counts.astype(emb_p.dtype))

        block_bytes = common_bytes + _nbytes((TB, Vp), emb_p.dtype)
        out_p = pl.pallas_call(
            _make_counts_kernel(1.0 / L),
            out_shape=jax.ShapeDtypeStruct((Bp, Cp), f32),
            grid_spec=pltpu.PrefetchScalarGridSpec(
                num_scalar_prefetch=0,
                grid=grid,
                in_specs=[
                    pl.BlockSpec((TB, Vp), lambda i: (i, 0)),   # counts tile
                    pl.BlockSpec((Vp, Dp), lambda i: (0, 0)),   # emb table
                    pl.BlockSpec((Dp, Hp), lambda i: (0, 0)),   # w1
                    pl.BlockSpec((1, Hp), lambda i: (0, 0)),    # b1
                    pl.BlockSpec((Hp, Cp), lambda i: (0, 0)),   # w2
                    pl.BlockSpec((1, Cp), lambda i: (0, 0)),    # b2
                ],
                out_specs=pl.BlockSpec((TB, Cp), lambda i: (i, 0)),
            ),
            compiler_params=pltpu.CompilerParams(
                dimension_semantics=("parallel",),
                vmem_limit_bytes=_vmem_limit(block_bytes),
            ),
        )(counts_p, emb_p, w1_p, b1_p, w2_p, b2_p)
    else:
        # ---- Path B: 1-D scalar-prefetched ids + sublane-packed gather ------
        ids_flat = jnp.zeros((Bp * L,), jnp.int32).at[:B * L].set(ids.reshape(-1))
        scratch_bytes = _nbytes((TB, Dp), f32)
        out_p = pl.pallas_call(
            _make_gather_kernel(L),
            out_shape=jax.ShapeDtypeStruct((Bp, Cp), f32),
            grid_spec=pltpu.PrefetchScalarGridSpec(
                num_scalar_prefetch=1,                     # flat ids -> SMEM
                grid=grid,
                in_specs=[
                    pl.BlockSpec((Vp, Dp), lambda i, ids: (0, 0)),   # emb table
                    pl.BlockSpec((Dp, Hp), lambda i, ids: (0, 0)),   # w1
                    pl.BlockSpec((1, Hp), lambda i, ids: (0, 0)),    # b1
                    pl.BlockSpec((Hp, Cp), lambda i, ids: (0, 0)),   # w2
                    pl.BlockSpec((1, Cp), lambda i, ids: (0, 0)),    # b2
                ],
                out_specs=pl.BlockSpec((TB, Cp), lambda i, ids: (i, 0)),
                scratch_shapes=[pltpu.VMEM((TB, Dp), f32)],
            ),
            compiler_params=pltpu.CompilerParams(
                dimension_semantics=("parallel",),
                vmem_limit_bytes=_vmem_limit(common_bytes, scratch_bytes),
            ),
        )(ids_flat, emb_p, w1_p, b1_p, w2_p, b2_p)

    return out_p[:B, :n_classes]


# ---------------------------------------------------------------------------
# Init + pure-JAX reference.
# ---------------------------------------------------------------------------
def init_params(key, n_classes, vocab_size, emb_dim, n_hidden_units):
    """Deterministic synthetic parameters matching the module's shapes."""
    k_emb, k_w1, k_b1, k_w2, k_b2 = jax.random.split(key, 5)
    emb = jax.random.normal(k_emb, (vocab_size, emb_dim), jnp.float32)
    emb = emb.at[0].set(0.0)  # padding_idx=0 -> zero embedding row
    lim1 = 1.0 / (emb_dim ** 0.5)
    w1 = jax.random.uniform(k_w1, (emb_dim, n_hidden_units), jnp.float32, -lim1, lim1)
    b1 = jax.random.uniform(k_b1, (1, n_hidden_units), jnp.float32, -lim1, lim1)
    lim2 = 1.0 / (n_hidden_units ** 0.5)
    w2 = jax.random.uniform(k_w2, (n_hidden_units, n_classes), jnp.float32, -lim2, lim2)
    b2 = jax.random.uniform(k_b2, (1, n_classes), jnp.float32, -lim2, lim2)
    return emb, w1, b1, w2, b2


def reference_forward(batch_inputs, emb, w1, b1, w2, b2):
    """Plain-JAX reference of the PyTorch forward for correctness checking."""
    x = emb[batch_inputs]          # (B, L, D) embedding lookup
    x = jnp.mean(x, axis=1)        # (B, D) mean over the full padded length
    x = jnp.maximum(x @ w1 + b1, 0.0)
    return x @ w2 + b2


if __name__ == "__main__":
    key = jax.random.PRNGKey(0)
    n_classes, vocab_size, emb_dim, n_hidden = 2, 64, 32, 32

    k_params, k_ids = jax.random.split(key)
    emb, w1, b1, w2, b2 = init_params(k_params, n_classes, vocab_size,
                                      emb_dim, n_hidden)
    fwd = jax.jit(ffnn_forward,
                  static_argnames=("n_classes", "use_counts", "batch_tile"))

    # --- Case 1: small vocab -> counts @ table MXU path (f32 params) --------
    batch, seq_len = 2, 8
    ids = jax.random.randint(k_ids, (batch, seq_len), 1, vocab_size,
                             dtype=jnp.int32)
    ids = ids.at[0, 6:].set(0).at[1, 4:].set(0)   # trailing PAD (id 0)
    # batch_lengths would be [6, 4] but the torch forward ignores it (mean is
    # over the full padded length) -- kept only as a comment for parity.
    arrays, use_counts = prepare_params(emb, w1, b1, w2, b2)
    logits = fwd(ids, arrays, n_classes=n_classes, use_counts=use_counts)
    jax.block_until_ready(logits)
    ref = reference_forward(ids, emb, w1, b1, w2, b2)
    assert logits.shape == (batch, n_classes)
    assert jnp.allclose(logits, ref, atol=1e-4, rtol=1e-4), (logits, ref)

    # --- Case 2: force the large-vocab gather path (odd L, 2-tile grid) -----
    batch2, seq_len2 = 16, 9
    ids2 = jax.random.randint(jax.random.fold_in(key, 1), (batch2, seq_len2),
                              0, vocab_size, dtype=jnp.int32)
    arrays2, use_counts2 = prepare_params(emb, w1, b1, w2, b2,
                                          small_vocab_threshold=0)
    logits2 = fwd(ids2, arrays2, n_classes=n_classes, use_counts=use_counts2)
    jax.block_until_ready(logits2)
    ref2 = reference_forward(ids2, emb, w1, b1, w2, b2)
    assert jnp.allclose(logits2, ref2, atol=1e-4, rtol=1e-4), (logits2, ref2)

    # --- Case 3: bf16 table/weights (capacity option), f32 accumulation -----
    arrays3, use_counts3 = prepare_params(emb, w1, b1, w2, b2,
                                          param_dtype=jnp.bfloat16)
    logits3 = fwd(ids, arrays3, n_classes=n_classes, use_counts=use_counts3)
    jax.block_until_ready(logits3)
    embq = emb.astype(jnp.bfloat16).astype(jnp.float32)
    w1q = w1.astype(jnp.bfloat16).astype(jnp.float32)
    w2q = w2.astype(jnp.bfloat16).astype(jnp.float32)
    ref3 = reference_forward(ids, embq, w1q, b1, w2q, b2)
    assert jnp.allclose(logits3, ref3, atol=1e-2, rtol=1e-2), (logits3, ref3)

    print("KERNEL_OK")
</pallas_src>

<mosaic_0001>
module attributes {stable_mosaic.version = 11 : i64} {
  func.func @kernel(%arg0: i32, %arg1: memref<8x128xf32, #tpu.memory_space<vmem>>, %arg2: memref<128x128xf32, #tpu.memory_space<vmem>>, %arg3: memref<128x128xf32, #tpu.memory_space<vmem>>, %arg4: memref<1x128xf32, #tpu.memory_space<vmem>>, %arg5: memref<128x128xf32, #tpu.memory_space<vmem>>, %arg6: memref<1x128xf32, #tpu.memory_space<vmem>>, %arg7: memref<8x128xf32, #tpu.memory_space<vmem>>) attributes {dimension_semantics = [#tpu.dimension_semantics<parallel>], iteration_bounds = array<i64: 1>, scalar_prefetch = 0 : i64, scratch_operands = 0 : i64, tpu.core_type = #tpu.core_type<tc>, window_params = [{transform_indices = @transform_0, window_bounds = array<i64: 8, 128>}, {pipeline_mode = #tpu.pipeline_mode<synchronous>, transform_indices = @transform_1, window_bounds = array<i64: 128, 128>}, {pipeline_mode = #tpu.pipeline_mode<synchronous>, transform_indices = @transform_2, window_bounds = array<i64: 128, 128>}, {pipeline_mode = #tpu.pipeline_mode<synchronous>, transform_indices = @transform_3, window_bounds = array<i64: 1, 128>}, {pipeline_mode = #tpu.pipeline_mode<synchronous>, transform_indices = @transform_4, window_bounds = array<i64: 128, 128>}, {pipeline_mode = #tpu.pipeline_mode<synchronous>, transform_indices = @transform_5, window_bounds = array<i64: 1, 128>}, {transform_indices = @transform_6, window_bounds = array<i64: 8, 128>}]} {
    %c0 = arith.constant 0 : index
    %c0_0 = arith.constant 0 : index
    %0 = vector.load %arg1[%c0, %c0_0] : memref<8x128xf32, #tpu.memory_space<vmem>>, vector<8x128xf32>
    %c0_1 = arith.constant 0 : index
    %c0_2 = arith.constant 0 : index
    %1 = vector.load %arg2[%c0_1, %c0_2] : memref<128x128xf32, #tpu.memory_space<vmem>>, vector<128x128xf32>
    %cst = arith.constant dense<0.000000e+00> : vector<8x128xf32>
    %2 = tpu.matmul %0, %1, %cst {dimension_numbers = #tpu.dot_dimension_numbers<[1], [0], [0], [1], [0, 0, 1, 1], [], []>} : vector<8x128xf32>, vector<128x128xf32>, vector<8x128xf32> -> vector<8x128xf32>
    %cst_3 = arith.constant 1.250000e-01 : f32
    %3 = vector.broadcast %cst_3 : f32 to vector<8x128xf32>
    %4 = arith.mulf %2, %3 : vector<8x128xf32>
    %c0_4 = arith.constant 0 : index
    %c0_5 = arith.constant 0 : index
    %5 = vector.load %arg3[%c0_4, %c0_5] : memref<128x128xf32, #tpu.memory_space<vmem>>, vector<128x128xf32>
    %cst_6 = arith.constant dense<0.000000e+00> : vector<8x128xf32>
    %6 = tpu.matmul %4, %5, %cst_6 {dimension_numbers = #tpu.dot_dimension_numbers<[1], [0], [0], [1], [0, 0, 1, 1], [], []>} : vector<8x128xf32>, vector<128x128xf32>, vector<8x128xf32> -> vector<8x128xf32>
    %c0_7 = arith.constant 0 : index
    %c0_8 = arith.constant 0 : index
    %7 = vector.load %arg4[%c0_7, %c0_8] : memref<1x128xf32, #tpu.memory_space<vmem>>, vector<1x128xf32>
    %8 = vector.broadcast %7 : vector<1x128xf32> to vector<8x128xf32>
    %9 = arith.addf %6, %8 : vector<8x128xf32>
    %cst_9 = arith.constant 0.000000e+00 : f32
    %10 = vector.broadcast %cst_9 : f32 to vector<8x128xf32>
    %11 = arith.maximumf %9, %10 : vector<8x128xf32>
    %c0_10 = arith.constant 0 : index
    %c0_11 = arith.constant 0 : index
    %12 = vector.load %arg5[%c0_10, %c0_11] : memref<128x128xf32, #tpu.memory_space<vmem>>, vector<128x128xf32>
    %cst_12 = arith.constant dense<0.000000e+00> : vector<8x128xf32>
    %13 = tpu.matmul %11, %12, %cst_12 {dimension_numbers = #tpu.dot_dimension_numbers<[1], [0], [0], [1], [0, 0, 1, 1], [], []>} : vector<8x128xf32>, vector<128x128xf32>, vector<8x128xf32> -> vector<8x128xf32>
    %c0_13 = arith.constant 0 : index
    %c0_14 = arith.constant 0 : index
    %14 = vector.load %arg6[%c0_13, %c0_14] : memref<1x128xf32, #tpu.memory_space<vmem>>, vector<1x128xf32>
    %15 = vector.broadcast %14 : vector<1x128xf32> to vector<8x128xf32>
    %16 = arith.addf %13, %15 : vector<8x128xf32>
    %c0_15 = arith.constant 0 : index
    %c0_16 = arith.constant 0 : index
    %17 = vector.load %arg7[%c0_15, %c0_16] : memref<8x128xf32, #tpu.memory_space<vmem>>, vector<8x128xf32>
    tpu.vector_store %arg7[%c0_15, %c0_16], %16 {strides = array<i32>} : memref<8x128xf32, #tpu.memory_space<vmem>>, vector<8x128xf32>,
    return
  }
  func.func @transform_0(%arg0: i32) -> (i32, i32) {
    %c0_i32 = arith.constant 0 : i32
    %c0_i32_0 = arith.constant 0 : i32
    return %arg0, %c0_i32 : i32, i32
  }
  func.func @transform_1(%arg0: i32) -> (i32, i32) {
    %c0_i32 = arith.constant 0 : i32
    %c0_i32_0 = arith.constant 0 : i32
    %c0_i32_1 = arith.constant 0 : i32
    return %c0_i32, %c0_i32_0 : i32, i32
  }
  func.func @transform_2(%arg0: i32) -> (i32, i32) {
    %c0_i32 = arith.constant 0 : i32
    %c0_i32_0 = arith.constant 0 : i32
    %c0_i32_1 = arith.constant 0 : i32
    return %c0_i32, %c0_i32_0 : i32, i32
  }
  func.func @transform_3(%arg0: i32) -> (i32, i32) {
    %c0_i32 = arith.constant 0 : i32
    %c0_i32_0 = arith.constant 0 : i32
    %c0_i32_1 = arith.constant 0 : i32
    return %c0_i32, %c0_i32_0 : i32, i32
  }
  func.func @transform_4(%arg0: i32) -> (i32, i32) {
    %c0_i32 = arith.constant 0 : i32
    %c0_i32_0 = arith.constant 0 : i32
    %c0_i32_1 = arith.constant 0 : i32
    return %c0_i32, %c0_i32_0 : i32, i32
  }
  func.func @transform_5(%arg0: i32) -> (i32, i32) {
    %c0_i32 = arith.constant 0 : i32
    %c0_i32_0 = arith.constant 0 : i32
    %c0_i32_1 = arith.constant 0 : i32
    return %c0_i32, %c0_i32_0 : i32, i32
  }
  func.func @transform_6(%arg0: i32) -> (i32, i32) {
    %c0_i32 = arith.constant 0 : i32
    %c0_i32_0 = arith.constant 0 : i32
    return %arg0, %c0_i32 : i32, i32
  }
}

</mosaic_0001>

<bundles_post_ra>
// kernel: ffnn_forward.1
= control target key start
LH: loop header
LB: loop body
LE: loop exit
PB: predicated region body
PF: predicated region fallthrough
CT: control target
= control target key end

     0   :  { %11 = vsyncpa [#allocation3], 0  ;;  %s340_s0 = inlined_call_operand.vmem [shape: f32[8,128], index: 0, kind: input, shape index: {}]   ;;  %s341_s1 = inlined_call_operand.hbm [shape: f32[128,128], index: 1, kind: input, shape index: {}]   ;;  %s342_s2 = inlined_call_operand.hbm [shape: f32[128,128], index: 2, kind: input, shape index: {}]   ;;  %s343_s3 = inlined_call_operand.vmem [shape: f32[1,128], index: 3, kind: input, shape index: {}]   ;;  %s344_s4 = inlined_call_operand.hbm [shape: f32[128,128], index: 4, kind: input, shape index: {}]   ;;  %s345_s5 = inlined_call_operand.vmem [shape: f32[1,128], index: 5, kind: input, shape index: {}]   ;;  %s346_s6 = inlined_call_operand.vmem [shape: f32[8,128], index: 6, kind: output, shape index: {}]  }
   0x1   :  { %12 = vsyncpa [#allocation5], 0  ;;  %s32_s23 = sshll.u32 %s342_s2, 4  ;;  %s279_s24 = smov [#allocation4]   ;;  %s33_s23 = int_to_ptr.hbm [resolvable:$true] %s32_s23 }
   0x2   :  { %s34_s25 = sshll.u32 %s279_s24, 4  ;;  %s19_s28 = sshll.u32 %s341_s1, 4  ;;  %s35_s25 = int_to_ptr.vmem [resolvable:$true] %s34_s25  ;;  %s20_s28 = int_to_ptr.hbm [resolvable:$true] %s19_s28 }
   0x3   :  { %s280_s29 = smov 128   ;;  %s281_s30 = smov 8  }
   0x4   :  { %40 = dma.hbm_to_vmem [thread:$0]  %s33_s23, 2048, %s35_s25, [#allocation5], %s280_s29, %s280_s29, %s281_s30  }
   0x5   :  { %s282_s7 = smov [#allocation2]   ;;  %s47_s11 = sshll.u32 %s344_s4, 4  ;;  %s48_s11 = int_to_ptr.hbm [resolvable:$true] %s47_s11 }
   0x6   :  { %s21_s8 = sshll.u32 %s282_s7, 4  ;;  %s283_s2 = smov [#allocation6]   ;;  %s22_s8 = int_to_ptr.vmem [resolvable:$true] %s21_s8 }
   0x7   :  { %27 = dma.hbm_to_vmem [thread:$0]  %s20_s28, 2048, %s22_s8, [#allocation3], %s280_s29, %s280_s29, %s281_s30  }
   0x8   :  { %s49_s12 = sshll.u32 %s283_s2, 4  ;;  %s50_s12 = int_to_ptr.vmem [resolvable:$true] %s49_s12 }
   0x9   :  { %55 = dma.hbm_to_vmem [thread:$0]  %s48_s11, 2048, %s50_s12, [#allocation5], %s280_s29, %s280_s29, %s281_s30  }
   0xa   :  { %275 = dma.done.wait [#allocation3], 2048  }
   0xb   :  { %276 = vsyncadd [#allocation3], 4294965248 }
   0xc   :  { %277 = dma.done.wait [#allocation5], 4096  }
   0xd   :  { %278 = vsyncadd [#allocation5], 4294963200  ;;  %v86_v0 = vld [vmem:[#allocation2 + $0x78] sm:$0xff]  ;;  %v85_v1 = vld [vmem:[#allocation2 + $0x70] sm:$0xff] }
   0xe   :  { %87 = vmatpush.msra.mxu0 %v86_v0  ;;  %v84_v2 = vld [vmem:[#allocation2 + $0x68] sm:$0xff]  ;;  %v83_v3 = vld [vmem:[#allocation2 + $0x60] sm:$0xff]  ;;  %v123_v4 = vld [vmem:[#allocation4 + $0x78] sm:$0xff] }
   0xf   :  { %v82_v5 = vld [vmem:[#allocation2 + $0x58] sm:$0xff]  ;;  %128 = vmatpush.msra.mxu1 %v123_v4  ;;  %v122_v6 = vld [vmem:[#allocation4 + $0x70] sm:$0xff]  ;;  %v121_v7 = vld [vmem:[#allocation4 + $0x68] sm:$0xff] }
  0x10   :  { %88 = vmatpush.msra.mxu0 %v85_v1  ;;  %v81_v8 = vld [vmem:[#allocation2 + $0x50] sm:$0xff]  ;;  %v120_v9 = vld [vmem:[#allocation4 + $0x60] sm:$0xff]  ;;  %v80_v10 = vld [vmem:[#allocation2 + $0x48] sm:$0xff] }
  0x11   :  { %129 = vmatpush.msra.mxu1 %v122_v6  ;;  %v119_v11 = vld [vmem:[#allocation4 + $0x58] sm:$0xff]  ;;  %v79_v12 = vld [vmem:[#allocation2 + $0x40] sm:$0xff]  ;;  %v118_v13 = vld [vmem:[#allocation4 + $0x50] sm:$0xff] }
  0x12   :  { %89 = vmatpush.msra.mxu0 %v84_v2  ;;  %v78_v14 = vld [vmem:[#allocation2 + $0x38] sm:$0xff]  ;;  %v117_v15 = vld [vmem:[#allocation4 + $0x48] sm:$0xff]  ;;  %v77_v16 = vld [vmem:[#allocation2 + $0x30] sm:$0xff] }
  0x13   :  { %130 = vmatpush.msra.mxu1 %v121_v7  ;;  %v116_v17 = vld [vmem:[#allocation4 + $0x40] sm:$0xff]  ;;  %v76_v18 = vld [vmem:[#allocation2 + $0x28] sm:$0xff]  ;;  %v115_v19 = vld [vmem:[#allocation4 + $0x38] sm:$0xff] }
  0x14   :  { %90 = vmatpush.msra.mxu0 %v83_v3  ;;  %v75_v20 = vld [vmem:[#allocation2 + $0x20] sm:$0xff]  ;;  %v114_v21 = vld [vmem:[#allocation4 + $0x30] sm:$0xff]  ;;  %v74_v22 = vld [vmem:[#allocation2 + $0x18] sm:$0xff] }
  0x15   :  { %131 = vmatpush.msra.mxu1 %v120_v9  ;;  %v113_v23 = vld [vmem:[#allocation4 + $0x28] sm:$0xff]  ;;  %v73_v24 = vld [vmem:[#allocation2 + $0x10] sm:$0xff]  ;;  %v112_v25 = vld [vmem:[#allocation4 + $0x20] sm:$0xff] }
  0x16   :  { %91 = vmatpush.msra.mxu0 %v82_v5  ;;  %v72_v26 = vld [vmem:[#allocation2 + $0x8] sm:$0xff]  ;;  %v111_v27 = vld [vmem:[#allocation4 + $0x18] sm:$0xff]  ;;  %v71_v28 = vld [vmem:[#allocation2] sm:$0xff] }
  0x17   :  { %132 = vmatpush.msra.mxu1 %v119_v11  ;;  %v70_v29 = vld [vmem:[%s340_s0] sm:$0xff]  ;;  %v110_v30 = vld [vmem:[#allocation4 + $0x10] sm:$0xff]  ;;  %v109_v31 = vld [vmem:[#allocation4 + $0x8] sm:$0xff] }
  0x18   :  { %92 = vmatpush.msra.mxu0 %v81_v8  ;;  %v108_v32 = vld [vmem:[#allocation4] sm:$0xff]  ;;  %v164_v33 = vld [vmem:[#allocation6 + $0x78] sm:$0xff]  ;;  %v163_v34 = vld [vmem:[#allocation6 + $0x70] sm:$0xff] }
  0x19   :  { %133 = vmatpush.msra.mxu1 %v118_v13  ;;  %169 = vmatpush.msra.mxu2 %v164_v33  ;;  %v162_v35 = vld [vmem:[#allocation6 + $0x68] sm:$0xff]  ;;  %v161_v36 = vld [vmem:[#allocation6 + $0x60] sm:$0xff]  ;;  %v160_v37 = vld [vmem:[#allocation6 + $0x58] sm:$0xff] }
  0x1a   :  { %93 = vmatpush.msra.mxu0 %v80_v10  ;;  %v159_v38 = vld [vmem:[#allocation6 + $0x50] sm:$0xff]  ;;  %v158_v39 = vld [vmem:[#allocation6 + $0x48] sm:$0xff]  ;;  %v157_v40 = vld [vmem:[#allocation6 + $0x40] sm:$0xff] }
  0x1b   :  { %134 = vmatpush.msra.mxu1 %v117_v15  ;;  %170 = vmatpush.msra.mxu2 %v163_v34  ;;  %v156_v41 = vld [vmem:[#allocation6 + $0x38] sm:$0xff]  ;;  %v155_v42 = vld [vmem:[#allocation6 + $0x30] sm:$0xff]  ;;  %v154_v43 = vld [vmem:[#allocation6 + $0x28] sm:$0xff] }
  0x1c   :  { %94 = vmatpush.msra.mxu0 %v79_v12  ;;  %v153_v44 = vld [vmem:[#allocation6 + $0x20] sm:$0xff]  ;;  %v152_v45 = vld [vmem:[#allocation6 + $0x18] sm:$0xff]  ;;  %v151_v48 = vld [vmem:[#allocation6 + $0x10] sm:$0xff] }
  0x1d   :  { %135 = vmatpush.msra.mxu1 %v116_v17  ;;  %171 = vmatpush.msra.mxu2 %v162_v35  ;;  %v150_v49 = vld [vmem:[#allocation6 + $0x8] sm:$0xff]  ;;  %v149_v50 = vld [vmem:[#allocation6] sm:$0xff] }
  0x1e   :  { %95 = vmatpush.msra.mxu0 %v78_v14  ;;  %v201_v51 = vld [vmem:[%s343_s3] ss:$0 sm:$0xff] }
  0x1f   :  { %136 = vmatpush.msra.mxu1 %v115_v19  ;;  %172 = vmatpush.msra.mxu2 %v161_v36  ;;  %v202_v55 = vld [vmem:[%s345_s5] ss:$0 sm:$0xff] }
  0x20   :  { %96 = vmatpush.msra.mxu0 %v77_v16 }
  0x21   :  { %137 = vmatpush.msra.mxu1 %v114_v21  ;;  %173 = vmatpush.msra.mxu2 %v160_v37 }
  0x22   :  { %97 = vmatpush.msra.mxu0 %v76_v18 }
  0x23   :  { %138 = vmatpush.msra.mxu1 %v113_v23  ;;  %174 = vmatpush.msra.mxu2 %v159_v38 }
  0x24   :  { %98 = vmatpush.msra.mxu0 %v75_v20 }
  0x25   :  { %139 = vmatpush.msra.mxu1 %v112_v25  ;;  %175 = vmatpush.msra.mxu2 %v158_v39 }
  0x26   :  { %99 = vmatpush.msra.mxu0 %v74_v22 }
  0x27   :  { %140 = vmatpush.msra.mxu1 %v111_v27  ;;  %176 = vmatpush.msra.mxu2 %v157_v40 }
  0x28   :  { %100 = vmatpush.msra.mxu0 %v73_v24 }
  0x29   :  { %141 = vmatpush.msra.mxu1 %v110_v30  ;;  %177 = vmatpush.msra.mxu2 %v156_v41 }
  0x2a   :  { %101 = vmatpush.msra.mxu0 %v72_v26 }
  0x2b   :  { %142 = vmatpush.msra.mxu1 %v109_v31  ;;  %178 = vmatpush.msra.mxu2 %v155_v42 }
  0x2c   :  { %102 = vmatpush.msra.mxu0 %v71_v28 }
  0x2d   :  { %103 = vmatmul.f32.vlgmr.msra.gmra.mxu0 %v70_v29  ;;  %143 = vmatpush.msra.mxu1 %v108_v32 }
  0x2e   :  { %179 = vmatpush.msra.mxu2 %v154_v43 }
  0x30   :  { %180 = vmatpush.msra.mxu2 %v153_v44 }
  0x32   :  { %181 = vmatpush.msra.mxu2 %v152_v45 }
  0x34   :  { %182 = vmatpush.msra.mxu2 %v151_v48 }
  0x36   :  { %183 = vmatpush.msra.mxu2 %v150_v49 }
  0x38   :  { %184 = vmatpush.msra.mxu2 %v149_v50 }
  0xaa   :  { %v104_v46 = vpop.f32.mrf.mxu0 }
  0xab   :  { %v107_v47 = vmul.f32 0.125, %v104_v46 }
  0xad   :  { %144 = vmatmul.f32.vlgmr.msra.gmra.mxu1 %v107_v47 }
 0x12a   :  { %v145_v52 = vpop.f32.mrf.mxu1 }
 0x12b   :  { %v146_v53 = vadd.f32 %v201_v51, %v145_v52 }
 0x12d   :  { %v148_v54 = vmax.f32 %v146_v53, 0.0 }
 0x12f   :  { %185 = vmatmul.f32.vlgmr.msra.gmra.mxu2 %v148_v54 }
 0x1b2   :  { %v186_v56 = vpop.f32.mrf.mxu2 }
 0x1b3   :  { %v187_v57 = vadd.f32 %v202_v55, %v186_v56 }
 0x1b5   :  { %189 = vst [vmem:[%s346_s6] sm:$0xff] %v187_v57 }
 0x1b6   :  { %194 = vsyncpa [#allocation3], 1 }
 0x1b7   :  { %195 = vsyncpa [#allocation5], 1 }

</bundles_post_ra>
